<compile_context>
chip_gen: v6e
topology: v6e:2x2x1
jax: 0.10.0
libtpu: 0.0.40
codegen_flags: <defaults>
</compile_context>

<pallas_src>
import jax
import jax.numpy as jnp
from jax import lax
from jax.experimental import pallas as pl
from jax.experimental.pallas import tpu as pltpu

_IGNORE_LABEL = 4
_LANE = 128


def _round_up(x: int, m: int) -> int:
    return ((x + m - 1) // m) * m


def _choose_tile(num_classes: int, hw: int, itemsize: int, tile_override):
    """Pick (tile_lanes, subslice_width) from a bytes-per-step + VMEM budget."""
    hw128 = _round_up(hw, _LANE)
    if tile_override is not None:
        tile = max(_LANE, _round_up(min(int(tile_override), hw128), _LANE))
    else:
        # ~1 MiB of pred per grid step amortizes the ~0.35us per-step overhead.
        target_lanes = max(_LANE, (1 << 20) // max(1, num_classes * itemsize))
        tile = min(hw128, _round_up(target_lanes, _LANE))
        # Explicit VMEM accounting: double-buffered inputs, sublane padding to 8.
        # Budget kept well under v5e's 16 MiB default and v7x's 64 MiB physical.
        c_pad = _round_up(num_classes, 8)
        per_lane = 2 * c_pad * itemsize + 2 * 8 * 4   # pred dbuf + target dbuf
        budget = 16 << 20
        while tile > _LANE and per_lane * tile > budget:
            tile = _round_up(tile // 2, _LANE)
    # Sub-slice width for register-chained accumulation (<=512 lanes keeps the
    # live partials to a handful of vregs with C padded to 8 sublanes).
    if tile % 512 == 0:
        wacc = 512
    elif tile % 256 == 0:
        wacc = 256
    else:
        wacc = _LANE
    # Bound the static unroll so trace/compile size stays sane.
    max_unroll = 64
    if tile // wacc > max_unroll:
        tile = wacc * max_unroll
    return tile, wacc


def _build_kernel(num_classes: int, tile: int, wacc: int, hw: int,
                  tiles_per_split: int, ignore_label: int):
    nsub = tile // wacc

    def kernel(p_ref, t_ref, oi_ref, oa_ref, ob_ref, acc_i, acc_a, acc_b):
        s = pl.program_id(1)      # spatial split (megacore coverage when B small)
        ti = pl.program_id(2)     # spatial tile within the split (reduction axis)

        @pl.when(ti == 0)
        def _init():
            acc_i[...] = jnp.zeros_like(acc_i)
            acc_a[...] = jnp.zeros_like(acc_a)
            acc_b[...] = jnp.zeros_like(acc_b)

        # Iotas built once per grid step at the narrow width (a couple of
        # vregs) and reused by every sub-slice below.
        cls = lax.broadcasted_iota(jnp.int32, (num_classes, wacc), 0)
        lane = lax.broadcasted_iota(jnp.int32, (1, wacc), 1)
        base = (s * tiles_per_split + ti) * tile   # global lane offset of block

        part_i = jnp.zeros((num_classes, wacc), jnp.float32)
        part_a = jnp.zeros((num_classes, wacc), jnp.float32)
        part_b = jnp.zeros((1, wacc), jnp.float32)

        # Register-chained accumulation over static lane sub-slices: the VMEM
        # accumulator read-modify-write happens once per grid step, not once
        # per sub-slice.
        for j in range(nsub):
            off = j * wacc                                         # static slice
            t = t_ref[0, :, off:off + wacc]                        # (1, wacc) i32
            p = p_ref[0, :, off:off + wacc].astype(jnp.float32)    # (C, wacc) f32
            pos = base + off + lane                                # global lane pos
            # Mask the ignore label AND the ragged/out-of-bounds tail; select
            # BEFORE any multiply so garbage lanes cannot produce NaN/Inf.
            valid = (t != ignore_label) & (pos < hw)               # (1, wacc)
            pm = jnp.where(valid, p, 0.0)                          # (C, wacc)
            onehot = jnp.where(valid, t, -1) == cls                # (C, wacc)
            part_i = part_i + jnp.where(onehot, pm, 0.0)           # pred * one_hot
            part_a = part_a + pm * pm                              # masked pred^2
            part_b = part_b + valid.astype(jnp.float32)            # valid count

        acc_i[...] += part_i
        acc_a[...] += part_a
        acc_b[...] += part_b

        @pl.when(ti == pl.num_programs(2) - 1)
        def _flush():
            # One cross-lane/sublane reduce per accumulator, once per
            # (batch, split): tiny lane-dense outputs instead of (B, C, tile).
            def reduce_row(acc):
                r = jnp.sum(acc[...], axis=0, keepdims=True)   # sublane reduce
                r = jnp.sum(r, axis=1, keepdims=True)          # lane reduce -> (1,1)
                return jnp.broadcast_to(r, (1, _LANE))
            oi_ref[0, 0] = reduce_row(acc_i)
            oa_ref[0, 0] = reduce_row(acc_a)
            ob_ref[0, 0] = reduce_row(acc_b)

    return kernel


def dice_loss_pallas(pred: jax.Array, target: jax.Array, num_classes: int,
                     weights: jax.Array | None = None, *, tile=None) -> jax.Array:
    """Pallas TPU implementation of Diceloss.forward.

    pred:   (B, C, H, W) float (f32 or bf16), C == num_classes
    target: (B, H, W) integer labels (label 4 is ignored)
    returns scalar float32 loss.
    """
    if weights is None:
        weights = jnp.ones((num_classes,), jnp.float32)  # unused in forward (matches torch)

    B, C, H, W = pred.shape
    assert C == num_classes
    assert target.shape == (B, H, W)
    HW = H * W

    itemsize = pred.dtype.itemsize
    tile_lanes, wacc = _choose_tile(C, HW, itemsize, tile)
    total_tiles = -(-HW // tile_lanes)
    # Keep both v7x TensorCores busy when the batch axis alone can't (B==1/odd).
    nsplit = 2 if (B % 2 == 1 and total_tiles >= 2) else 1
    tps = -(-total_tiles // nsplit)

    # Free, contiguous reshapes only — no padded copy of pred through HBM.
    pred_f = pred.reshape(B, C, HW)
    target_f = target.reshape(B, 1, HW).astype(jnp.int32)

    kernel = _build_kernel(C, tile_lanes, wacc, HW, tps, _IGNORE_LABEL)

    def in_map(b, s, t):
        # Clamp so a padded (s, t) never DMAs past the array; its contribution
        # is masked to zero in-kernel via the global lane-position test.
        blk = jnp.minimum(s * tps + t, total_tiles - 1)
        return (b, 0, blk)

    out_map = lambda b, s, t: (b, s, 0, 0)
    out_sds = jax.ShapeDtypeStruct((B, nsplit, 1, _LANE), jnp.float32)
    out_spec = pl.BlockSpec((1, 1, 1, _LANE), out_map)

    grid_spec = pltpu.PrefetchScalarGridSpec(
        num_scalar_prefetch=0,
        grid=(B, nsplit, tps),
        in_specs=[
            pl.BlockSpec((1, C, tile_lanes), in_map),   # pred
            pl.BlockSpec((1, 1, tile_lanes), in_map),   # target
        ],
        out_specs=[out_spec, out_spec, out_spec],
        scratch_shapes=[
            pltpu.VMEM((C, wacc), jnp.float32),   # intersection accumulator
            pltpu.VMEM((C, wacc), jnp.float32),   # pred^2 accumulator
            pltpu.VMEM((1, wacc), jnp.float32),   # valid-count accumulator
        ],
    )

    cost = pl.CostEstimate(
        flops=8 * B * C * HW,
        transcendentals=0,
        bytes_accessed=(pred_f.size * itemsize + target_f.size * 4
                        + 3 * B * nsplit * _LANE * 4),
    )

    oi, oa, ob = pl.pallas_call(
        kernel,
        out_shape=(out_sds, out_sds, out_sds),
        grid_spec=grid_spec,
        compiler_params=pltpu.CompilerParams(
            # batch & spatial-split axes shard across TensorCores; the inner
            # spatial axis accumulates.
            dimension_semantics=("parallel", "parallel", "arbitrary"),
            # Explicit limit: safe on v5e/v6e (128 MiB physical) and within
            # v7x's 64 MiB; actual usage is budgeted <= ~16 MiB in _choose_tile.
            vmem_limit_bytes=32 * 1024 * 1024,
        ),
        cost_estimate=cost,
    )(pred_f, target_f)

    # Constant-cost glue: 3 scalars per (batch, split) -> dice formula.
    intersection = jnp.sum(oi[..., 0])
    a_sum = jnp.sum(oa[..., 0])
    b_sum = jnp.sum(ob[..., 0])
    smooth = jnp.float32(1.0)
    return 1.0 - (2.0 * intersection + smooth) / (a_sum + b_sum + smooth)


def dice_loss_ref(pred, target, num_classes):
    """Pure-JAX reference mirroring the PyTorch forward exactly."""
    label = jax.nn.one_hot(target, num_classes, dtype=jnp.float32)      # (B,H,W,C)
    label = jnp.transpose(label, (0, 3, 1, 2))                          # (B,C,H,W)
    smooth = 1.0
    mask = (target != _IGNORE_LABEL)[:, None, :, :].astype(jnp.float32)
    pm = pred.astype(jnp.float32) * mask
    lm = label * mask
    intersection = jnp.sum(pm * lm)
    a_sum = jnp.sum(pm * pm)
    b_sum = jnp.sum(lm * lm)
    return 1.0 - (2.0 * intersection + smooth) / (a_sum + b_sum + smooth)


if __name__ == "__main__":
    def run_case(key, B, H, W, num_classes, dtype, tile=None):
        k1, k2 = jax.random.split(key)
        logits = jax.random.normal(k1, (B, num_classes, H, W), jnp.float32)
        pred = jax.nn.softmax(logits, axis=1).astype(dtype)
        target = jax.random.randint(k2, (B, H, W), 0, num_classes, jnp.int32)
        loss = jax.block_until_ready(
            dice_loss_pallas(pred, target, num_classes, tile=tile))
        ref = jax.block_until_ready(dice_loss_ref(pred, target, num_classes))
        assert jnp.allclose(loss, ref, rtol=1e-5, atol=1e-5), (B, H, W, loss, ref)

    k1, k2, k3 = jax.random.split(jax.random.PRNGKey(0), 3)
    # Primary case: batch=2, classes=5 (class 4 = ignore), 16x16 spatial.
    run_case(k1, B=2, H=16, W=16, num_classes=5, dtype=jnp.float32)
    # Ragged spatial extent (HW=400, not a multiple of the 128-lane tile) with
    # B=1 -> exercises the in-kernel tail mask and the 2-way spatial split.
    run_case(k2, B=1, H=20, W=20, num_classes=5, dtype=jnp.float32, tile=128)
    # bf16 pred + multi-sub-slice register-chained accumulation path.
    run_case(k3, B=2, H=32, W=32, num_classes=5, dtype=jnp.bfloat16)

    print("KERNEL_OK")
</pallas_src>

<mosaic_0001>
module attributes {stable_mosaic.version = 11 : i64} {
  func.func @kernel(%arg0: i32, %arg1: i32, %arg2: i32, %arg3: memref<1x5x256xf32, #tpu.memory_space<vmem>>, %arg4: memref<1x1x256xi32, #tpu.memory_space<vmem>>, %arg5: memref<1x1x1x128xf32, #tpu.memory_space<vmem>>, %arg6: memref<1x1x1x128xf32, #tpu.memory_space<vmem>>, %arg7: memref<1x1x1x128xf32, #tpu.memory_space<vmem>>, %arg8: memref<5x256xf32, #tpu.memory_space<vmem>>, %arg9: memref<5x256xf32, #tpu.memory_space<vmem>>, %arg10: memref<1x256xf32, #tpu.memory_space<vmem>>) attributes {dimension_semantics = [#tpu.dimension_semantics<parallel>, #tpu.dimension_semantics<parallel>, #tpu.dimension_semantics<arbitrary>], iteration_bounds = array<i64: 2, 1, 1>, scalar_prefetch = 0 : i64, scratch_operands = 3 : i64, tpu.core_type = #tpu.core_type<tc>, window_params = [{transform_indices = @transform_0, window_bounds = array<i64: 1, 5, 256>}, {transform_indices = @transform_1, window_bounds = array<i64: 1, 1, 256>}, {transform_indices = @transform_2, window_bounds = array<i64: 1, 1, 1, 128>}, {transform_indices = @transform_3, window_bounds = array<i64: 1, 1, 1, 128>}, {transform_indices = @transform_4, window_bounds = array<i64: 1, 1, 1, 128>}]} {
    %c0_i32 = arith.constant 0 : i32
    %0 = arith.cmpi eq, %arg2, %c0_i32 : i32
    %1 = arith.extui %0 : i1 to i32
    %c0_i32_0 = arith.constant 0 : i32
    %2 = arith.cmpi ne, %1, %c0_i32_0 : i32
    scf.if %2 {
      %cst_26 = arith.constant 0.000000e+00 : f32
      %51 = vector.broadcast %cst_26 : f32 to vector<5x256xf32>
      %c0_27 = arith.constant 0 : index
      %c0_28 = arith.constant 0 : index
      %52 = vector.load %arg8[%c0_27, %c0_28] : memref<5x256xf32, #tpu.memory_space<vmem>>, vector<5x256xf32>
      tpu.vector_store %arg8[%c0_27, %c0_28], %51 {strides = array<i32>} : memref<5x256xf32, #tpu.memory_space<vmem>>, vector<5x256xf32>,
      %cst_29 = arith.constant 0.000000e+00 : f32
      %53 = vector.broadcast %cst_29 : f32 to vector<5x256xf32>
      %c0_30 = arith.constant 0 : index
      %c0_31 = arith.constant 0 : index
      %54 = vector.load %arg9[%c0_30, %c0_31] : memref<5x256xf32, #tpu.memory_space<vmem>>, vector<5x256xf32>
      tpu.vector_store %arg9[%c0_30, %c0_31], %53 {strides = array<i32>} : memref<5x256xf32, #tpu.memory_space<vmem>>, vector<5x256xf32>,
      %cst_32 = arith.constant 0.000000e+00 : f32
      %55 = vector.broadcast %cst_32 : f32 to vector<1x256xf32>
      %c0_33 = arith.constant 0 : index
      %c0_34 = arith.constant 0 : index
      %56 = vector.load %arg10[%c0_33, %c0_34] : memref<1x256xf32, #tpu.memory_space<vmem>>, vector<1x256xf32>
      tpu.vector_store %arg10[%c0_33, %c0_34], %55 {strides = array<i32>} : memref<1x256xf32, #tpu.memory_space<vmem>>, vector<1x256xf32>,
    } else {
    }
    %3 = tpu.iota {dimensions = array<i32: 0>} : vector<5x256xi32>
    %4 = tpu.iota {dimensions = array<i32: 1>} : vector<1x256xi32>
    %c1_i32 = arith.constant 1 : i32
    %5 = arith.muli %arg1, %c1_i32 : i32
    %6 = arith.addi %5, %arg2 : i32
    %c256_i32 = arith.constant 256 : i32
    %7 = arith.muli %6, %c256_i32 : i32
    %cst = arith.constant 0.000000e+00 : f32
    %8 = vector.broadcast %cst : f32 to vector<5x256xf32>
    %cst_1 = arith.constant 0.000000e+00 : f32
    %9 = vector.broadcast %cst_1 : f32 to vector<5x256xf32>
    %cst_2 = arith.constant 0.000000e+00 : f32
    %10 = vector.broadcast %cst_2 : f32 to vector<1x256xf32>
    %c0 = arith.constant 0 : index
    %c0_3 = arith.constant 0 : index
    %c0_4 = arith.constant 0 : index
    %11 = vector.load %arg4[%c0, %c0_3, %c0_4] : memref<1x1x256xi32, #tpu.memory_space<vmem>>, vector<1x1x256xi32>
    %12 = vector.shape_cast %11 : vector<1x1x256xi32> to vector<1x256xi32>
    %c0_5 = arith.constant 0 : index
    %c0_6 = arith.constant 0 : index
    %c0_7 = arith.constant 0 : index
    %13 = vector.load %arg3[%c0_5, %c0_6, %c0_7] : memref<1x5x256xf32, #tpu.memory_space<vmem>>, vector<1x5x256xf32>
    %14 = vector.shape_cast %13 : vector<1x5x256xf32> to vector<5x256xf32>
    %c0_i32_8 = arith.constant 0 : i32
    %15 = arith.addi %7, %c0_i32_8 : i32
    %16 = vector.broadcast %15 : i32 to vector<1x256xi32>
    %17 = arith.addi %16, %4 : vector<1x256xi32>
    %c4_i32 = arith.constant 4 : i32
    %18 = vector.broadcast %c4_i32 : i32 to vector<1x256xi32>
    %19 = arith.cmpi ne, %12, %18 : vector<1x256xi32>
    %c256_i32_9 = arith.constant 256 : i32
    %20 = vector.broadcast %c256_i32_9 : i32 to vector<1x256xi32>
    %21 = arith.cmpi slt, %17, %20 : vector<1x256xi32>
    %22 = arith.andi %19, %21 : vector<1x256xi1>
    %cst_10 = arith.constant 0.000000e+00 : f32
    %23 = vector.shape_cast %22 : vector<1x256xi1> to vector<1x256xi1>
    %24 = vector.broadcast %23 : vector<1x256xi1> to vector<5x256xi1>
    %25 = vector.broadcast %cst_10 : f32 to vector<5x256xf32>
    %26 = arith.select %24, %14, %25 : vector<5x256xi1>, vector<5x256xf32>
    %c-1_i32 = arith.constant -1 : i32
    %27 = vector.broadcast %c-1_i32 : i32 to vector<1x256xi32>
    %28 = arith.select %22, %12, %27 : vector<1x256xi1>, vector<1x256xi32>
    %29 = vector.broadcast %28 : vector<1x256xi32> to vector<5x256xi32>
    %30 = arith.cmpi eq, %29, %3 : vector<5x256xi32>
    %cst_11 = arith.constant 0.000000e+00 : f32
    %31 = vector.broadcast %cst_11 : f32 to vector<5x256xf32>
    %32 = arith.select %30, %26, %31 : vector<5x256xi1>, vector<5x256xf32>
    %33 = arith.addf %8, %32 : vector<5x256xf32>
    %34 = arith.mulf %26, %26 : vector<5x256xf32>
    %35 = arith.addf %9, %34 : vector<5x256xf32>
    %36 = arith.extui %22 : vector<1x256xi1> to vector<1x256xi32>
    %37 = arith.sitofp %36 : vector<1x256xi32> to vector<1x256xf32>
    %38 = arith.addf %10, %37 : vector<1x256xf32>
    %c0_12 = arith.constant 0 : index
    %c0_13 = arith.constant 0 : index
    %39 = vector.load %arg8[%c0_12, %c0_13] : memref<5x256xf32, #tpu.memory_space<vmem>>, vector<5x256xf32>
    %40 = arith.addf %39, %33 : vector<5x256xf32>
    %c0_14 = arith.constant 0 : index
    %c0_15 = arith.constant 0 : index
    %41 = vector.load %arg8[%c0_14, %c0_15] : memref<5x256xf32, #tpu.memory_space<vmem>>, vector<5x256xf32>
    tpu.vector_store %arg8[%c0_14, %c0_15], %40 {strides = array<i32>} : memref<5x256xf32, #tpu.memory_space<vmem>>, vector<5x256xf32>,
    %c0_16 = arith.constant 0 : index
    %c0_17 = arith.constant 0 : index
    %42 = vector.load %arg9[%c0_16, %c0_17] : memref<5x256xf32, #tpu.memory_space<vmem>>, vector<5x256xf32>
    %43 = arith.addf %42, %35 : vector<5x256xf32>
    %c0_18 = arith.constant 0 : index
    %c0_19 = arith.constant 0 : index
    %44 = vector.load %arg9[%c0_18, %c0_19] : memref<5x256xf32, #tpu.memory_space<vmem>>, vector<5x256xf32>
    tpu.vector_store %arg9[%c0_18, %c0_19], %43 {strides = array<i32>} : memref<5x256xf32, #tpu.memory_space<vmem>>, vector<5x256xf32>,
    %c0_20 = arith.constant 0 : index
    %c0_21 = arith.constant 0 : index
    %45 = vector.load %arg10[%c0_20, %c0_21] : memref<1x256xf32, #tpu.memory_space<vmem>>, vector<1x256xf32>
    %46 = arith.addf %45, %38 : vector<1x256xf32>
    %c0_22 = arith.constant 0 : index
    %c0_23 = arith.constant 0 : index
    %47 = vector.load %arg10[%c0_22, %c0_23] : memref<1x256xf32, #tpu.memory_space<vmem>>, vector<1x256xf32>
    tpu.vector_store %arg10[%c0_22, %c0_23], %46 {strides = array<i32>} : memref<1x256xf32, #tpu.memory_space<vmem>>, vector<1x256xf32>,
    %c0_i32_24 = arith.constant 0 : i32
    %48 = arith.cmpi eq, %arg2, %c0_i32_24 : i32
    %49 = arith.extui %48 : i1 to i32
    %c0_i32_25 = arith.constant 0 : i32
    %50 = arith.cmpi ne, %49, %c0_i32_25 : i32
    scf.if %50 {
      %c0_26 = arith.constant 0 : index
      %c0_27 = arith.constant 0 : index
      %51 = vector.load %arg8[%c0_26, %c0_27] : memref<5x256xf32, #tpu.memory_space<vmem>>, vector<5x256xf32>
      %cst_28 = arith.constant dense<0.000000e+00> : vector<256xf32>
      %52 = vector.multi_reduction <add>, %51, %cst_28 [0] : vector<5x256xf32> to vector<256xf32>
      %53 = vector.shape_cast %52 : vector<256xf32> to vector<1x256xf32>
      %cst_29 = arith.constant dense<0.000000e+00> : vector<1xf32>
      %54 = vector.multi_reduction <add>, %53, %cst_29 [1] : vector<1x256xf32> to vector<1xf32>
      %55 = vector.shape_cast %54 : vector<1xf32> to vector<1x1xf32>
      %56 = vector.shape_cast %55 : vector<1x1xf32> to vector<1x1xf32>
      %57 = vector.broadcast %56 : vector<1x1xf32> to vector<1x128xf32>
      %c0_30 = arith.constant 0 : index
      %c0_31 = arith.constant 0 : index
      %c0_32 = arith.constant 0 : index
      %c0_33 = arith.constant 0 : index
      %58 = vector.load %arg5[%c0_30, %c0_31, %c0_32, %c0_33] : memref<1x1x1x128xf32, #tpu.memory_space<vmem>>, vector<1x1x1x128xf32>
      %59 = vector.shape_cast %58 : vector<1x1x1x128xf32> to vector<1x128xf32>
      %60 = vector.shape_cast %57 : vector<1x128xf32> to vector<1x1x1x128xf32>
      tpu.vector_store %arg5[%c0_30, %c0_31, %c0_32, %c0_33], %60 {strides = array<i32>} : memref<1x1x1x128xf32, #tpu.memory_space<vmem>>, vector<1x1x1x128xf32>,
      %c0_34 = arith.constant 0 : index
      %c0_35 = arith.constant 0 : index
      %61 = vector.load %arg9[%c0_34, %c0_35] : memref<5x256xf32, #tpu.memory_space<vmem>>, vector<5x256xf32>
      %cst_36 = arith.constant dense<0.000000e+00> : vector<256xf32>
      %62 = vector.multi_reduction <add>, %61, %cst_36 [0] : vector<5x256xf32> to vector<256xf32>
      %63 = vector.shape_cast %62 : vector<256xf32> to vector<1x256xf32>
      %cst_37 = arith.constant dense<0.000000e+00> : vector<1xf32>
      %64 = vector.multi_reduction <add>, %63, %cst_37 [1] : vector<1x256xf32> to vector<1xf32>
      %65 = vector.shape_cast %64 : vector<1xf32> to vector<1x1xf32>
      %66 = vector.shape_cast %65 : vector<1x1xf32> to vector<1x1xf32>
      %67 = vector.broadcast %66 : vector<1x1xf32> to vector<1x128xf32>
      %c0_38 = arith.constant 0 : index
      %c0_39 = arith.constant 0 : index
      %c0_40 = arith.constant 0 : index
      %c0_41 = arith.constant 0 : index
      %68 = vector.load %arg6[%c0_38, %c0_39, %c0_40, %c0_41] : memref<1x1x1x128xf32, #tpu.memory_space<vmem>>, vector<1x1x1x128xf32>
      %69 = vector.shape_cast %68 : vector<1x1x1x128xf32> to vector<1x128xf32>
      %70 = vector.shape_cast %67 : vector<1x128xf32> to vector<1x1x1x128xf32>
      tpu.vector_store %arg6[%c0_38, %c0_39, %c0_40, %c0_41], %70 {strides = array<i32>} : memref<1x1x1x128xf32, #tpu.memory_space<vmem>>, vector<1x1x1x128xf32>,
      %c0_42 = arith.constant 0 : index
      %c0_43 = arith.constant 0 : index
      %71 = vector.load %arg10[%c0_42, %c0_43] : memref<1x256xf32, #tpu.memory_space<vmem>>, vector<1x256xf32>
      %cst_44 = arith.constant dense<0.000000e+00> : vector<256xf32>
      %72 = vector.multi_reduction <add>, %71, %cst_44 [0] : vector<1x256xf32> to vector<256xf32>
      %73 = vector.shape_cast %72 : vector<256xf32> to vector<1x256xf32>
      %cst_45 = arith.constant dense<0.000000e+00> : vector<1xf32>
      %74 = vector.multi_reduction <add>, %73, %cst_45 [1] : vector<1x256xf32> to vector<1xf32>
      %75 = vector.shape_cast %74 : vector<1xf32> to vector<1x1xf32>
      %76 = vector.shape_cast %75 : vector<1x1xf32> to vector<1x1xf32>
      %77 = vector.broadcast %76 : vector<1x1xf32> to vector<1x128xf32>
      %c0_46 = arith.constant 0 : index
      %c0_47 = arith.constant 0 : index
      %c0_48 = arith.constant 0 : index
      %c0_49 = arith.constant 0 : index
      %78 = vector.load %arg7[%c0_46, %c0_47, %c0_48, %c0_49] : memref<1x1x1x128xf32, #tpu.memory_space<vmem>>, vector<1x1x1x128xf32>
      %79 = vector.shape_cast %78 : vector<1x1x1x128xf32> to vector<1x128xf32>
      %80 = vector.shape_cast %77 : vector<1x128xf32> to vector<1x1x1x128xf32>
      tpu.vector_store %arg7[%c0_46, %c0_47, %c0_48, %c0_49], %80 {strides = array<i32>} : memref<1x1x1x128xf32, #tpu.memory_space<vmem>>, vector<1x1x1x128xf32>,
    } else {
    }
    return
  }
  func.func @transform_0(%arg0: i32, %arg1: i32, %arg2: i32) -> (i32, i32, i32) {
    %c1_i32 = arith.constant 1 : i32
    %0 = arith.muli %arg1, %c1_i32 : i32
    %1 = arith.addi %0, %arg2 : i32
    %c0_i32 = arith.constant 0 : i32
    %2 = arith.minsi %1, %c0_i32 : i32
    %c0_i32_0 = arith.constant 0 : i32
    %c0_i32_1 = arith.constant 0 : i32
    return %arg0, %c0_i32_0, %2 : i32, i32, i32
  }
  func.func @transform_1(%arg0: i32, %arg1: i32, %arg2: i32) -> (i32, i32, i32) {
    %c1_i32 = arith.constant 1 : i32
    %0 = arith.muli %arg1, %c1_i32 : i32
    %1 = arith.addi %0, %arg2 : i32
    %c0_i32 = arith.constant 0 : i32
    %2 = arith.minsi %1, %c0_i32 : i32
    %c0_i32_0 = arith.constant 0 : i32
    %c0_i32_1 = arith.constant 0 : i32
    return %arg0, %c0_i32_0, %2 : i32, i32, i32
  }
  func.func @transform_2(%arg0: i32, %arg1: i32, %arg2: i32) -> (i32, i32, i32, i32) {
    %c0_i32 = arith.constant 0 : i32
    %c0_i32_0 = arith.constant 0 : i32
    %c0_i32_1 = arith.constant 0 : i32
    return %arg0, %arg1, %c0_i32, %c0_i32_0 : i32, i32, i32, i32
  }
  func.func @transform_3(%arg0: i32, %arg1: i32, %arg2: i32) -> (i32, i32, i32, i32) {
    %c0_i32 = arith.constant 0 : i32
    %c0_i32_0 = arith.constant 0 : i32
    %c0_i32_1 = arith.constant 0 : i32
    return %arg0, %arg1, %c0_i32, %c0_i32_0 : i32, i32, i32, i32
  }
  func.func @transform_4(%arg0: i32, %arg1: i32, %arg2: i32) -> (i32, i32, i32, i32) {
    %c0_i32 = arith.constant 0 : i32
    %c0_i32_0 = arith.constant 0 : i32
    %c0_i32_1 = arith.constant 0 : i32
    return %arg0, %arg1, %c0_i32, %c0_i32_0 : i32, i32, i32, i32
  }
}

</mosaic_0001>

<bundles_post_ra>
// kernel: tpu_custom_call.1
= control target key start
LH: loop header
LB: loop body
LE: loop exit
PB: predicated region body
PF: predicated region fallthrough
CT: control target
= control target key end

     0   :  { %s1136_s0 = inlined_call_operand.vmem [shape: f32[2,5,256], index: 0, kind: input, shape index: {}]   ;;  %s1137_s1 = inlined_call_operand.vmem [shape: s32[2,1,256], index: 1, kind: input, shape index: {}]   ;;  %s1138_s2 = inlined_call_operand.hbm [shape: f32[2,1,1,128], index: 2, kind: output, shape index: {0}]   ;;  %s1139_s3 = inlined_call_operand.hbm [shape: f32[2,1,1,128], index: 3, kind: output, shape index: {1}]   ;;  %s1140_s4 = inlined_call_operand.hbm [shape: f32[2,1,1,128], index: 4, kind: output, shape index: {2}]  }
   0x1   :  { %1143 = sst [smem:[#allocation12_spill]] %s1136_s0 }
   0x2   :  { %1144 = sst [smem:[#allocation13_spill]] %s1137_s1 }
   0x3   :  { %10 = vsyncpa [#allocation6], 0 }
   0x4   :  { %12 = vsyncpa [#allocation6 + $0x1], 0 }
   0x5   :  { %13 = vsyncpa [#allocation8], 0 }
   0x6   :  { %15 = vsyncpa [#allocation8 + $0x1], 0  ;;  %s935_s15 = smov 0   ;;  %s937_s16 = smov 0  }
   0x7   :  { %s939_s17 = smov 0   ;;  %s941_s18 = smov 0  }
   0x8   :  { %s943_s19 = smov 0   ;;  %s945_s20 = smov 0  }
   0x9 LB: > { %s685_s21 = sadd.s32 4294967295, %s901_s20   ;;  %s1141_s22 = sadd.s32 4294967294, %s901_s20   ;;  %s901_s20 = sphi %s945_s20, %s21_s20   ;;  %s897_s19 = sphi %s943_s19, %s1157_s19   ;;  %s893_s18 = sphi %s941_s18, %s1156_s18   ;;  %s889_s17 = sphi %s939_s17, %s1155_s17   ;;  %s885_s16 = sphi %s937_s16, %s1154_s16   ;;  %s881_s15 = sphi %s935_s15, %s1153_s15  }
   0xa   : > { %s40_s23 = sadd.s32 1, %s897_s19  ;;  %s117_s24 = sadd.s32 1, %s889_s17 }
   0xb   : > { %p42_p0 = scmp.ge.s32.totalorder %s40_s23, 2  ;;  %p127_p1 = scmp.ne.s32.totalorder %s889_s17, %s885_s16 }
   0xc   : > { %p128_p2 = scmp.eq.s32.totalorder %s685_s21, 1  ;;  %p133_p3 = scmp.ne.s32.totalorder %s885_s16, %s881_s15 }
   0xd   : > { %s1159_s23 = smov (%p42_p0, %s40_s23), 0  ;;  %p134_p5 = scmp.eq.s32.totalorder %s1141_s22, 1 }
   0xe   : > { %p977_p4 = por %p128_p2, %p127_p1  ;;  %s112_s26 = ssub.s32 %s897_s19, %s1159_s23 }
   0xf   : > { %p689_p6 = scmp.ge.s32.totalorder %s901_s20, 1  ;;  %p115_p7 = scmp.eq.s32.totalorder %s112_s26, 0 }
  0x10   : > { %p986_p8 = por %p134_p5, %p133_p3  ;;  %p245_p9 = scmp.lt.s32.totalorder %s901_s20, 3 }
  0x11   : > { %s992_s28 = scalar_select %p115_p7, %s889_s17, %s117_s24  }
  0x12   : > { %p246_p10 = pnand %p689_p6, %p245_p9 }
  0x13   : > { %p300_p11 = scmp.lt.s32.totalorder (!%p246_p10), %s893_s18, 1  ;;  %s1149_s1 = sld [smem:[#allocation13_spill]] (!%p246_p10) }
  0x14   : > { %249 = sbr.rel (%p246_p10) target bundleno = 264 (0x108), region = 28  ;;  %s1150_s0 = sld [smem:[#allocation12_spill]] (!%p246_p10) }
  0x15   : > { %s1011_s12 = sand.u32 (!%p246_p10), 1, %s885_s16  }
  0x16   : > { %s295_s13 = scalar_lea.vmem (!%p246_p10), [#allocation9], %s1011_s12  ;;  %s289_s14 = scalar_lea.vmem (!%p246_p10), [#allocation7], %s1011_s12 }
  0x17   : > { %s528_s24 = sshll.u32 (!%p246_p10), %s289_s14, 4  ;;  %s542_s26 = sshll.u32 (!%p246_p10), %s295_s13, 4  ;;  %s1023_s24 = int_to_ptr.vmem [resolvable:$true] %s528_s24  ;;  %s1025_s26 = int_to_ptr.vmem [resolvable:$true] %s542_s26 }
  0x18   : > { %s1142_s5 = scalar_lea.vmem (!%p246_p10), [#allocation5], %s1011_s12 }
  0x19   : > { %v335_v0 = vlaneseq  ;;  %v903_v1 = vmov 0.0   ;;  %v904_v2 = vmov 1966171168   ;;  %s301_s29 = scalar_select %p300_p11, %s893_s18, 1  ;;  %v905_v6 = vmov 1  }
  0x1a   : > { %333 = vst [vmem:[#allocation3 + $0x8] sm:$0x1f] %v903_v1  ;;  %334 = vst [vmem:[#allocation3] sm:$0x1f] %v903_v1  ;;  %v360_v3 = vunpack.c.l.s4 %v904_v2  ;;  %v358_v7 = vcombine.low %v905_v6, %v905_v6  ;;  %v906_v16 = vmov 0   ;;  %vm485_vm8 = vcmask 1040384  }
  0x1b   : > { %331 = vst [vmem:[#allocation2] sm:$0x1f] %v903_v1  ;;  %332 = vst [vmem:[#allocation2 + $0x8] sm:$0x1f] %v903_v1  ;;  %v341_v4 = vshrl.u32 %v335_v0, 7  ;;  %vm996_vm0 = vcmp.lt.s32.totalorder %v335_v0, 256 }
  0x1c   : > { %v361_v8 = vunpack.c.0.s8 %v360_v3  ;;  %339 = vst.msk [vmem:[#allocation4] sm:$0x3] %vm996_vm0, %v903_v1  ;;  %s692_s30 = sshll.u32 %s301_s29, 1  ;;  %s699_s8 = sshll.u32 %s301_s29, 4  ;;  %vm433_vm9 = vcmask 1044480  }
  0x1d   : > { %s322_s7 = scalar_lea.vmem %s1149_s1, %s692_s30  ;;  %v378_v13 = vsub.s32 0, %v341_v4  ;;  %v382_v14 = vsub.s32 1, %v341_v4  ;;  %s307_s11 = scalar_lea.vmem %s1150_s0, %s699_s8 }
  0x1e   : > { %v364_v9 = vsub.s32 %v361_v8, %v341_v4  ;;  %v347_v10 = vld [vmem:[%s322_s7] sm:$0x3]  ;;  %v349_v21 = vld [vmem:[%s307_s11 + $0x8] sm:$0x1f]  ;;  %s1017_s29 = sand.u32 1, %s685_s21   ;;  %s694_s30 = sshll.u32 %s893_s18, 4 }
  0x1f   : > { %vm353_vm1 = vcmp.ne.s32.totalorder %v347_v10, 4  ;;  %v348_v20 = vld [vmem:[%s307_s11] sm:$0x1f]  ;;  %s514_s6 = sshll.u32 %s1142_s5, 4  ;;  %s1030_s9 = scalar_lea.hbm %s1139_s3, %s694_s30  ;;  %s1032_s6 = int_to_ptr.vmem [resolvable:$true] %s514_s6 }
  0x20   : > { %v365_v11 = vrot.slane %v358_v7, %v364_v9  ;;  %s1037_s10 = scalar_lea.hbm %s1140_s4, %s694_s30  ;;  %s1042_s22 = scalar_lea.hbm %s1138_s2, %s694_s30 }
  0x21   : > { %v415_v31 = vld [vmem:[#allocation3 + $0x8] sm:$0x1f]  ;;  %v416_v32 = vld [vmem:[#allocation3] sm:$0x1f]  ;;  %s497_s5 = scalar_lea.sflag [#allocation8], %s1017_s29  ;;  %s769_s0 = scalar_lea.vmem %s1023_s24, 16 }
  0x22   : > { %v372_v12 = vrot.slane %v365_v11, %v364_v9  ;;  %v409_v27 = vld [vmem:[#allocation2] sm:$0x1f]  ;;  %v410_v28 = vld [vmem:[#allocation2 + $0x8] sm:$0x1f]  ;;  %p770_p12 = scmp.ne.s32.totalorder %s1023_s24, %s769_s0  ;;  %s907_s7 = smov [#allocation7]  }
  0x23   : > { %v421_v15 = vld [vmem:[#allocation4] sm:$0x3]  ;;  %s773_s8 = sshll.u32 %s907_s7, 4  ;;  %s774_s8 = int_to_ptr.vmem [resolvable:$false] %s773_s8 }
  0x24   : > { %vm373_vm2 = vcmp.ne.s32.totalorder %v372_v12, 0  ;;  %p771_p13 = pnand %p770_p12, %p977_p4  ;;  %s775_s1 = scalar_lea.vmem %s774_s8, 32 }
  0x25   : > { %vm374_vm3 = vmand %vm353_vm1, %vm373_vm2  ;;  %p776_p1 = scmp.lt.s32.totalorder %s1023_s24, %s774_s8  ;;  %p777_p2 = scmp.lt.s32.totalorder %s775_s1, %s769_s0 }
  0x26   : > { %v375_v17 = vsel %vm374_vm3, 1, %v906_v16  ;;  %v693_v18 = vsel %vm374_vm3, 1.0, %v903_v1  ;;  %v388_v19 = vsel %vm374_vm3, %v347_v10, 4294967295  ;;  %p772_p0 = pneg %p771_p13 }
  0x27   : > { %v379_v22 = vrot.slane %v375_v17, %v378_v13  ;;  %v383_v23 = vrot.slane %v375_v17, %v382_v14  ;;  %v422_v24 = vadd.f32 %v693_v18, %v421_v15  ;;  %v392_v25 = vrot.slane %v388_v19, %v378_v13  ;;  %p778_p3 = por %p777_p2, %p776_p1 }
  0x28   : > { %v396_v26 = vrot.slane %v388_v19, %v382_v14 }
  0x29   : > { %vm384_vm4 = vcmp.eq.s32.totalorder %v379_v22, 1  ;;  %vm385_vm5 = vcmp.eq.s32.totalorder %v383_v23, 1  ;;  %427 = vst.msk [vmem:[#allocation4] sm:$0x3] %vm996_vm0, %v422_v24  ;;  %vm397_vm6 = vcmp.eq.s32.totalorder %v392_v25, %v341_v4  ;;  %p779_p5 = pnand %p778_p3, %p772_p0 }
  0x2a   : > { %v386_v29 = vsel %vm384_vm4, %v348_v20, 0.0  ;;  %v387_v30 = vsel %vm385_vm5, %v349_v21, 0.0  ;;  %vm398_vm7 = vcmp.eq.s32.totalorder %v396_v26, %v341_v4 }
  0x2b   : > { %v403_v33 = vmul.f32 %v386_v29, %v386_v29  ;;  %v404_v34 = vmul.f32 %v387_v30, %v387_v30  ;;  %v399_v35 = vsel %vm397_vm6, %v386_v29, 0.0  ;;  %v400_v36 = vsel %vm398_vm7, %v387_v30, 0.0 }
  0x2c   : > { %v411_v37 = vadd.f32 %v409_v27, %v399_v35  ;;  %v412_v38 = vadd.f32 %v410_v28, %v400_v36 }
  0x2d   : > { %v417_v39 = vadd.f32 %v415_v31, %v403_v33  ;;  %v418_v40 = vadd.f32 %v416_v32, %v404_v34 }
  0x2e   : > { %413 = vst [vmem:[#allocation2] sm:$0x1f] %v411_v37  ;;  %414 = vst [vmem:[#allocation2 + $0x8] sm:$0x1f] %v412_v38 }
  0x2f   : > { %419 = vst [vmem:[#allocation3 + $0x8] sm:$0x1f] %v417_v39  ;;  %420 = vst [vmem:[#allocation3] sm:$0x1f] %v418_v40 }
  0x30   : > { %v472_v41 = vld [vmem:[#allocation4] sm:$0x3] }
  0x31   : > { %v478_v42 = vrot.slane %v472_v41, %v378_v13  ;;  %v482_v43 = vrot.slane %v472_v41, %v382_v14 }
  0x33   : > { %v486_v44 = vsel %vm485_vm8, %v478_v42, 0.0  ;;  %v487_v45 = vsel %vm485_vm8, %v482_v43, 0.0 }
  0x34   : > { %v488_v46 = vadd.f32 %v487_v45, %v486_v44 }
  0x35   : > { %v431_v47 = vld [vmem:[#allocation2] sm:$0x1f]  ;;  %v432_v48 = vld [vmem:[#allocation2 + $0x8] sm:$0x1f] }
  0x36   : > { %v452_v49 = vld [vmem:[#allocation3 + $0x8] sm:$0x1f]  ;;  %v453_v50 = vld [vmem:[#allocation3] sm:$0x1f]  ;;  %489 = vadd.xlane.f32.xlu1 %v488_v46  ;;  %v434_v51 = vsel %vm433_vm9, %v431_v47, 0.0  ;;  %v441_v52 = vsel %vm433_vm9, %v432_v48, 0.0 }
  0x37   : > { %v454_v53 = vsel %vm433_vm9, %v452_v49, 0.0  ;;  %v461_v54 = vsel %vm433_vm9, %v453_v50, 0.0  ;;  %v435_v55 = vrot.slane %v434_v51, 4  ;;  %v442_v56 = vrot.slane %v441_v52, 4 }
  0x38   : > { %v455_v57 = vrot.slane %v454_v53, 4  ;;  %v462_v58 = vrot.slane %v461_v54, 4 }
  0x39   : > { %v436_v59 = vadd.f32 %v435_v55, %v434_v51  ;;  %v443_v60 = vadd.f32 %v442_v56, %v441_v52 }
  0x3a   : > { %v456_v61 = vadd.f32 %v455_v57, %v454_v53  ;;  %v463_v62 = vadd.f32 %v462_v58, %v461_v54 }
  0x3b   : > { %v437_v63 = vrot.slane %v436_v59, 2  ;;  %v444_v0 = vrot.slane %v443_v60, 2 }
  0x3c   : > { %v457_v1 = vrot.slane %v456_v61, 2  ;;  %v464_v2 = vrot.slane %v463_v62, 2 }
  0x3d   : > { %v438_v3 = vadd.f32 %v437_v63, %v436_v59  ;;  %v445_v4 = vadd.f32 %v444_v0, %v443_v60 }
  0x3e   : > { %v458_v5 = vadd.f32 %v457_v1, %v456_v61  ;;  %v465_v6 = vadd.f32 %v464_v2, %v463_v62 }
  0x3f   : > { %v439_v7 = vrot.slane %v438_v3, 1  ;;  %v446_v8 = vrot.slane %v445_v4, 1 }
  0x40   : > { %v459_v9 = vrot.slane %v458_v5, 1  ;;  %v466_v10 = vrot.slane %v465_v6, 1 }
  0x41   : > { %v440_v13 = vadd.f32 %v439_v7, %v438_v3  ;;  %v447_v14 = vadd.f32 %v446_v8, %v445_v4 }
  0x42   : > { %v460_v11 = vadd.f32 %v459_v9, %v458_v5  ;;  %v467_v12 = vadd.f32 %v466_v10, %v465_v6 }
  0x43   : > { %v448_v16 = vadd.f32 %v447_v14, %v440_v13 }
  0x44   : > { %v468_v15 = vadd.f32 %v467_v12, %v460_v11 }
  0x46   : > { %469 = vadd.xlane.f32.xlu0 %v468_v15 }
  0x4a   : > { %449 = vadd.xlane.f32.xlu0 %v448_v16 }
  0xbf   : > { %v490_v17 = vpop.xlane.xlu1 %489 }
  0xc0   : > { %491 = vst [vmem:[%s295_s13] sm:$0x1] %v490_v17 }
  0xcf   : > { %v470_v18 = vpop.xlane.xlu0 %469 }
  0xd0   : > { %471 = vst [vmem:[%s289_s14] sm:$0x1] %v470_v18 }
  0xd1   : > { %782 = shalt.err (!%p779_p5)
}
  0xd2   : > { %s783_s14 = scalar_lea.hbm %s1030_s9, 16  ;;  %s787_s18 = scalar_lea.hbm %s1139_s3, 32 }
  0xd3   : > { %p784_p6 = scmp.ne.s32.totalorder %s1030_s9, %s783_s14  ;;  %p788_p10 = scmp.lt.s32.totalorder %s1030_s9, %s1139_s3 }
  0xd4   : > { %p789_p11 = scmp.lt.s32.totalorder %s787_s18, %s783_s14 }
  0xd5   : > { %p785_p7 = pnand %p784_p6, %p977_p4 }
  0xd6   : > { %p790_p12 = por %p789_p11, %p788_p10 }
  0xd7   : > { %p786_p9 = pneg %p785_p7 }
  0xd9   : > { %p791_p13 = pnand %p790_p12, %p786_p9 }
  0xdb   : > { %794 = shalt.err (!%p791_p13)
}
  0xdc   : > { %701 = dma.vmem_to_hbm [thread:$0]  (%p977_p4), %s1023_s24, 16, %s1030_s9, %s497_s5  }
  0xdd   : > { %s795_s0 = scalar_lea.vmem %s1025_s26, 16  ;;  %s908_s1 = smov [#allocation9]  }
  0xde   : > { %p796_p0 = scmp.ne.s32.totalorder %s1025_s26, %s795_s0  ;;  %s799_s7 = sshll.u32 %s908_s1, 4  ;;  %s800_s7 = int_to_ptr.vmem [resolvable:$false] %s799_s7 }
  0xdf   : > { %s801_s8 = scalar_lea.vmem %s800_s7, 32  ;;  %p802_p3 = scmp.lt.s32.totalorder %s1025_s26, %s800_s7 }
  0xe0   : > { %p797_p1 = pnand %p796_p0, %p977_p4  ;;  %p803_p5 = scmp.lt.s32.totalorder %s801_s8, %s795_s0 }
  0xe2   : > { %p798_p2 = pneg %p797_p1  ;;  %p804_p6 = por %p803_p5, %p802_p3 }
  0xe4   : > { %p805_p7 = pnand %p804_p6, %p798_p2 }
  0xe6   : > { %808 = shalt.err (!%p805_p7)
}
  0xe7   : > { %s809_s14 = scalar_lea.hbm %s1037_s10, 16  ;;  %s813_s30 = scalar_lea.hbm %s1140_s4, 32 }
  0xe8   : > { %p810_p9 = scmp.ne.s32.totalorder %s1037_s10, %s809_s14  ;;  %p814_p12 = scmp.lt.s32.totalorder %s1037_s10, %s1140_s4 }
  0xe9   : > { %p815_p13 = scmp.lt.s32.totalorder %s813_s30, %s809_s14 }
  0xea   : > { %p811_p10 = pnand %p810_p9, %p977_p4 }
  0xeb   : > { %p816_p0 = por %p815_p13, %p814_p12 }
  0xec   : > { %p812_p11 = pneg %p811_p10 }
  0xee   : > { %p817_p1 = pnand %p816_p0, %p812_p11 }
  0xf0   : > { %820 = shalt.err (!%p817_p1)
}
  0xf1   : > { %702 = dma.vmem_to_hbm [thread:$0]  (%p977_p4), %s1025_s26, 16, %s1037_s10, %s497_s5   ;;  %v450_v19 = vpop.xlane.xlu0 %449 }
  0xf2   : > { %s1151_s11 = scalar_lea.vmem [#allocation5], %s1011_s12  ;;  %s493_s13 = scalar_lea.sflag [#allocation6], %s1011_s12 }
  0xf3   : > { %451 = vst [vmem:[%s1151_s11] sm:$0x1] %v450_v19  ;;  %s821_s0 = scalar_lea.vmem %s1032_s6, 16  ;;  %s909_s1 = smov [#allocation5]  }
  0xf4   : > { %p822_p2 = scmp.ne.s32.totalorder %s1032_s6, %s821_s0  ;;  %s825_s29 = sshll.u32 %s909_s1, 4  ;;  %s826_s29 = int_to_ptr.vmem [resolvable:$false] %s825_s29 }
  0xf5   : > { %s827_s7 = scalar_lea.vmem %s826_s29, 32  ;;  %p828_p6 = scmp.lt.s32.totalorder %s1032_s6, %s826_s29 }
  0xf6   : > { %p823_p3 = pnand %p822_p2, %p977_p4  ;;  %p829_p7 = scmp.lt.s32.totalorder %s827_s7, %s821_s0 }
  0xf8   : > { %p824_p5 = pneg %p823_p3  ;;  %p830_p9 = por %p829_p7, %p828_p6 }
  0xfa   : > { %p831_p10 = pnand %p830_p9, %p824_p5 }
  0xfc   : > { %834 = shalt.err (!%p831_p10)
}
  0xfd   : > { %s835_s26 = scalar_lea.hbm %s1042_s22, 16  ;;  %s839_s10 = scalar_lea.hbm %s1138_s2, 32 }
  0xfe   : > { %p836_p11 = scmp.ne.s32.totalorder %s1042_s22, %s835_s26  ;;  %p840_p0 = scmp.lt.s32.totalorder %s1042_s22, %s1138_s2 }
  0xff   : > { %p841_p1 = scmp.lt.s32.totalorder %s839_s10, %s835_s26 }
 0x100   : > { %p837_p12 = pnand %p836_p11, %p977_p4 }
 0x101   : > { %p842_p2 = por %p841_p1, %p840_p0 }
 0x102   : > { %p838_p13 = pneg %p837_p12 }
 0x104   : > { %p843_p3 = pnand %p842_p2, %p838_p13 }
 0x106   : > { %846 = shalt.err (!%p843_p3)
}
 0x107   : > { %700 = dma.vmem_to_hbm [thread:$0]  (%p977_p4), %s1032_s6, 16, %s1042_s22, %s493_s13  }
 0x108 PF: > { %p716_p5 = scmp.ge.s32.totalorder %s901_s20, 2  ;;  %s554_s24 = sand.u32 1, %s881_s15  }
 0x109   : > { %s555_s9 = scalar_lea.sflag [#allocation6], %s554_s24 }
 0x10a   : > { %p707_p6 = pnand %p716_p5, %p986_p8 }
 0x10c   : > { %p708_p7 = pneg %p707_p6 }
 0x10e   : > { %872 = dma.done.wait (%p708_p7), %s555_s9, 16  }
 0x10f   : > { %874 = vsyncadd (%p708_p7), %s555_s9, 4294967280  ;;  %s1152_s30 = sadd.s32 4294967294, %s901_s20  }
 0x110   : > { %s562_s21 = sand.u32 1, %s1152_s30  }
 0x111   : > { %s563_s18 = scalar_lea.sflag [#allocation8], %s562_s21 }
 0x112   : > { %876 = dma.done.wait (%p708_p7), %s563_s18, 32  }
 0x113   : > { %878 = vsyncadd (%p708_p7), %s563_s18, 4294967264  ;;  %s21_s20 = sadd.s32 1, %s901_s20   ;;  %s1153_s15 = smov %s885_s16 }
 0x114   : > { %p18_p4 = scmp.ge.s32.totalorder %s21_s20, 4   ;;  %s1154_s16 = smov %s889_s17 }
 0x115   : > { %s1155_s17 = smov %s992_s28  ;;  %s1156_s18 = smov %s897_s19 }
 0x116   : > { %s1157_s19 = smov %s1159_s23  ;;  %20 = sbr.rel (!%p18_p4) target bundleno = 9 (0x9), region = 106 }
 0x11b   :  { %575 = vsyncpa [#allocation6], 1 }
 0x11c   :  { %577 = vsyncpa [#allocation6 + $0x1], 1 }
 0x11d   :  { %578 = vsyncpa [#allocation8], 1 }
 0x11e   :  { %580 = vsyncpa [#allocation8 + $0x1], 1 }

</bundles_post_ra>
